<compile_context>
chip_gen: v6e
topology: v6e:2x2x1
jax: 0.10.0
libtpu: 0.0.40
codegen_flags: <defaults>
</compile_context>

<pallas_src>
import jax
import jax.numpy as jnp
from jax.experimental import pallas as pl
from jax.experimental.pallas import tpu as pltpu


def _se_gate_conv1x1_kernel(g_ref, w_ref, x_ref, o_ref):
    # g_ref: (1, Cin)        f32 gate logits
    # w_ref: (TCout, Cin)    f32 1x1-conv weight tile
    # x_ref: (1, Cin, HW)    f32 activation (same block revisited -> DMA'd once per n)
    # o_ref: (1, TCout, HW)
    g = g_ref[...]
    # Exact sigmoid: stable for any logit magnitude (1/(1+inf) == 0 in IEEE).
    gate = 1.0 / (1.0 + jnp.exp(-g))                                  # (1, Cin)
    # Fold the per-channel gate into the small (Cout, Cin) weight instead of the
    # (Cin, HW) activation: TCout*Cin multiplies instead of Cin*HW, and the MXU
    # consumes x directly from VMEM.
    w_gated = w_ref[...] * gate                                       # (TCout, Cin)
    o_ref[0] = jnp.dot(
        w_gated, x_ref[0], preferred_element_type=jnp.float32
    ).astype(o_ref.dtype)                                             # 1x1 conv == channel matmul


def _tensorcores_per_chip():
    """Best-effort TC count per chip: v7x has 2, v5e/v6e have 1."""
    try:
        kind = jax.devices()[0].device_kind.lower()
    except Exception:
        return 1
    return 2 if "v7" in kind else 1


def se_gate_conv1x1(gate_nchw, x_nchw, weight_oihw):
    """conv1x1( x * sigmoid(gate) ); inputs NCHW / OIHW, no bias, f32 throughout."""
    N, Cin, H, W = x_nchw.shape
    Cout = weight_oihw.shape[0]
    HW = H * W

    # Contiguous reshapes only — no NCHW<->NHWC transposes.
    x3d = x_nchw.reshape(N, Cin, HW)
    g2d = gate_nchw.reshape(N, Cin)
    w2d = weight_oihw.reshape(Cout, Cin)

    out_dtype = x_nchw.dtype
    # Min second-to-last tile dim for the output block (f32: 8, bf16: 16).
    min_tile = 8 if jnp.dtype(out_dtype).itemsize >= 4 else 16

    # Cout split only where it can actually buy parallelism:
    #  - single-TC chips (v5e/v6e): never split (a 2nd grid step is purely
    #    sequential overhead + duplicated gate work).
    #  - v7x with N >= 2: the N grid axis already shards across both cores with
    #    disjoint x blocks; splitting Cout would duplicate the x DMA per core.
    #  - v7x with N == 1: split Cout 2-way so both cores have work.
    n_ct = 1
    if N == 1 and _tensorcores_per_chip() >= 2:
        if Cout % 2 == 0 and (Cout // 2) % min_tile == 0:
            n_ct = 2
    tcout = Cout // n_ct

    itemsize = jnp.dtype(out_dtype).itemsize
    cost = pl.CostEstimate(
        flops=2 * N * HW * Cin * Cout + N * Cin * Cout,
        transcendentals=N * Cin,
        bytes_accessed=(x3d.size + g2d.size + w2d.size + N * Cout * HW) * itemsize,
    )

    out = pl.pallas_call(
        _se_gate_conv1x1_kernel,
        out_shape=jax.ShapeDtypeStruct((N, Cout, HW), out_dtype),
        grid_spec=pltpu.PrefetchScalarGridSpec(
            num_scalar_prefetch=0,
            grid=(N, n_ct),
            in_specs=[
                pl.BlockSpec((1, Cin), lambda n, j: (n, 0)),
                pl.BlockSpec((tcout, Cin), lambda n, j: (j, 0)),
                pl.BlockSpec((1, Cin, HW), lambda n, j: (n, 0, 0)),
            ],
            out_specs=pl.BlockSpec((1, tcout, HW), lambda n, j: (n, j, 0)),
        ),
        compiler_params=pltpu.CompilerParams(
            dimension_semantics=("parallel", "parallel"),
        ),
        cost_estimate=cost,
    )(g2d, w2d, x3d)

    # TODO(synk): for SE blocks with much larger feature maps (e.g. HW=3136),
    # pad HW to a multiple of 128 and tile it at ~512-1024 lanes (lane-dense,
    # unmasked stores), and set vmem_limit_bytes sized against v7x's 64 MiB VMEM.
    return out.reshape(N, Cout, H, W)


if __name__ == "__main__":
    key = jax.random.PRNGKey(0)
    k1, k2, k3 = jax.random.split(key, 3)

    # Shapes from the PyTorch module: x123 (1,480,14,14), x127 (1,480,1,1),
    # Conv2d(480, 112, kernel=1, bias=False).
    N, Cin, H, W, Cout = 1, 480, 14, 14, 112
    x123 = jax.random.normal(k1, (N, Cin, H, W), dtype=jnp.float32)
    x127 = jax.random.normal(k2, (N, Cin, 1, 1), dtype=jnp.float32)
    bound = 1.0 / (Cin ** 0.5)
    w = jax.random.uniform(k3, (Cout, Cin, 1, 1), dtype=jnp.float32,
                           minval=-bound, maxval=bound)

    out = se_gate_conv1x1(x127, x123, w)
    out = jax.block_until_ready(out)
    assert out.shape == (N, Cout, H, W), out.shape

    # sanity check against plain-JAX reference of the module forward
    gate = jax.nn.sigmoid(x127)
    ref = jnp.einsum("nchw,oc->nohw", x123 * gate, w.reshape(Cout, Cin))
    assert jnp.allclose(out, ref, atol=1e-2, rtol=1e-2)

    print("KERNEL_OK")
</pallas_src>

<mosaic_0001>
module attributes {stable_mosaic.version = 11 : i64} {
  func.func @_se_gate_conv1x1_kernel(%arg0: i32, %arg1: i32, %arg2: memref<1x480xf32, #tpu.memory_space<vmem>>, %arg3: memref<112x480xf32, #tpu.memory_space<vmem>>, %arg4: memref<1x480x196xf32, #tpu.memory_space<vmem>>, %arg5: memref<1x112x196xf32, #tpu.memory_space<vmem>>) attributes {dimension_semantics = [#tpu.dimension_semantics<parallel>, #tpu.dimension_semantics<parallel>], iteration_bounds = array<i64: 1, 1>, scalar_prefetch = 0 : i64, scratch_operands = 0 : i64, tpu.core_type = #tpu.core_type<tc>, window_params = [{transform_indices = @transform_0, window_bounds = array<i64: 1, 480>}, {transform_indices = @transform_1, window_bounds = array<i64: 112, 480>}, {transform_indices = @transform_2, window_bounds = array<i64: 1, 480, 196>}, {transform_indices = @transform_3, window_bounds = array<i64: 1, 112, 196>}]} {
    %c0 = arith.constant 0 : index
    %c0_0 = arith.constant 0 : index
    %0 = vector.load %arg2[%c0, %c0_0] : memref<1x480xf32, #tpu.memory_space<vmem>>, vector<1x480xf32>
    %cst = arith.constant 0.000000e+00 : f32
    %1 = vector.broadcast %cst : f32 to vector<1x480xf32>
    %2 = arith.subf %1, %0 : vector<1x480xf32>
    %3 = math.exp %2 : vector<1x480xf32>
    %cst_1 = arith.constant 1.000000e+00 : f32
    %4 = vector.broadcast %cst_1 : f32 to vector<1x480xf32>
    %5 = arith.addf %4, %3 : vector<1x480xf32>
    %cst_2 = arith.constant 1.000000e+00 : f32
    %6 = vector.broadcast %cst_2 : f32 to vector<1x480xf32>
    %7 = arith.divf %6, %5 : vector<1x480xf32>
    %c0_3 = arith.constant 0 : index
    %c0_4 = arith.constant 0 : index
    %8 = vector.load %arg3[%c0_3, %c0_4] : memref<112x480xf32, #tpu.memory_space<vmem>>, vector<112x480xf32>
    %9 = vector.broadcast %7 : vector<1x480xf32> to vector<112x480xf32>
    %10 = arith.mulf %8, %9 : vector<112x480xf32>
    %c0_5 = arith.constant 0 : index
    %c0_6 = arith.constant 0 : index
    %c0_7 = arith.constant 0 : index
    %11 = vector.load %arg4[%c0_5, %c0_6, %c0_7] : memref<1x480x196xf32, #tpu.memory_space<vmem>>, vector<1x480x196xf32>
    %12 = vector.shape_cast %11 : vector<1x480x196xf32> to vector<480x196xf32>
    %cst_8 = arith.constant dense<0.000000e+00> : vector<112x196xf32>
    %13 = tpu.matmul %10, %12, %cst_8 {dimension_numbers = #tpu.dot_dimension_numbers<[1], [0], [0], [1], [0, 0, 1, 1], [], []>} : vector<112x480xf32>, vector<480x196xf32>, vector<112x196xf32> -> vector<112x196xf32>
    %c0_9 = arith.constant 0 : index
    %c0_10 = arith.constant 0 : index
    %c0_11 = arith.constant 0 : index
    %14 = vector.load %arg5[%c0_9, %c0_10, %c0_11] : memref<1x112x196xf32, #tpu.memory_space<vmem>>, vector<1x112x196xf32>
    %15 = vector.shape_cast %14 : vector<1x112x196xf32> to vector<112x196xf32>
    %16 = vector.shape_cast %13 : vector<112x196xf32> to vector<1x112x196xf32>
    tpu.vector_store %arg5[%c0_9, %c0_10, %c0_11], %16 {strides = array<i32>} : memref<1x112x196xf32, #tpu.memory_space<vmem>>, vector<1x112x196xf32>,
    return
  }
  func.func @transform_0(%arg0: i32, %arg1: i32) -> (i32, i32) {
    %c0_i32 = arith.constant 0 : i32
    %c0_i32_0 = arith.constant 0 : i32
    return %arg0, %c0_i32 : i32, i32
  }
  func.func @transform_1(%arg0: i32, %arg1: i32) -> (i32, i32) {
    %c0_i32 = arith.constant 0 : i32
    %c0_i32_0 = arith.constant 0 : i32
    return %arg1, %c0_i32 : i32, i32
  }
  func.func @transform_2(%arg0: i32, %arg1: i32) -> (i32, i32, i32) {
    %c0_i32 = arith.constant 0 : i32
    %c0_i32_0 = arith.constant 0 : i32
    %c0_i32_1 = arith.constant 0 : i32
    return %arg0, %c0_i32, %c0_i32_0 : i32, i32, i32
  }
  func.func @transform_3(%arg0: i32, %arg1: i32) -> (i32, i32, i32) {
    %c0_i32 = arith.constant 0 : i32
    %c0_i32_0 = arith.constant 0 : i32
    return %arg0, %arg1, %c0_i32 : i32, i32, i32
  }
}

</mosaic_0001>

<bundles_post_ra>
// kernel: tpu_custom_call.1
= control target key start
LH: loop header
LB: loop body
LE: loop exit
PB: predicated region body
PF: predicated region fallthrough
CT: control target
= control target key end

     0   :  { %vm274_vm0 = vcmask 785408   ;;  %vm616_vm1 = vcmask 556032   ;;  %s1393_s2 = inlined_call_operand.vmem [shape: f32[1,480,196], index: 2, kind: input, shape index: {}]   ;;  %s1394_s0 = inlined_call_operand.vmem [shape: f32[1,480], index: 0, kind: input, shape index: {}]   ;;  %s1395_s1 = inlined_call_operand.vmem [shape: f32[112,480], index: 1, kind: input, shape index: {}]   ;;  %s1396_s3 = inlined_call_operand.vmem [shape: f32[1,112,196], index: 3, kind: output, shape index: {}]  }
   0x1   :  { %v185_v0 = vld [vmem:[%s1393_s2 + $0xf8] sm:$0xff]  ;;  %v184_v1 = vld [vmem:[%s1393_s2 + $0xf0] sm:$0xff]  ;;  %v183_v2 = vld [vmem:[%s1393_s2 + $0xe8] sm:$0xff] }
   0x2   :  { %317 = vmatprep.subr.mxu0 %v185_v0  ;;  %v182_v3 = vld [vmem:[%s1393_s2 + $0xe0] sm:$0xff]  ;;  %v181_v4 = vld [vmem:[%s1393_s2 + $0xd8] sm:$0xff]  ;;  %v180_v6 = vld [vmem:[%s1393_s2 + $0xd0] sm:$0xff] }
   0x3   :  { %318 = vmatpush1.msra.mxu0 %v184_v1  ;;  %v249_v5 = vld [vmem:[%s1393_s2 + $0x2f8] sm:$0xff]  ;;  %v248_v7 = vld [vmem:[%s1393_s2 + $0x2f0] sm:$0xff]  ;;  %v247_v8 = vld [vmem:[%s1393_s2 + $0x2e8] sm:$0xff] }
   0x4   :  { %319 = vmatprep.subr.mxu0 %v183_v2  ;;  %466 = vmatprep.subr.mxu1 %v249_v5  ;;  %v179_v9 = vld [vmem:[%s1393_s2 + $0xc8] sm:$0xff]  ;;  %v246_v10 = vld [vmem:[%s1393_s2 + $0x2e0] sm:$0xff]  ;;  %v245_v12 = vld [vmem:[%s1393_s2 + $0x2d8] sm:$0xff] }
   0x5   :  { %320 = vmatpush1.msra.mxu0 %v182_v3  ;;  %467 = vmatpush1.msra.mxu1 %v248_v7  ;;  %v178_v11 = vld [vmem:[%s1393_s2 + $0xc0] sm:$0xff]  ;;  %v244_v13 = vld [vmem:[%s1393_s2 + $0x2d0] sm:$0xff]  ;;  %v177_v14 = vld [vmem:[%s1393_s2 + $0xb8] sm:$0xff] }
   0x6   :  { %321 = vmatprep.subr.mxu0 %v181_v4  ;;  %468 = vmatprep.subr.mxu1 %v247_v8  ;;  %v243_v15 = vld [vmem:[%s1393_s2 + $0x2c8] sm:$0xff]  ;;  %v176_v16 = vld [vmem:[%s1393_s2 + $0xb0] sm:$0xff]  ;;  %v242_v17 = vld [vmem:[%s1393_s2 + $0x2c0] sm:$0xff] }
   0x7   :  { %322 = vmatpush1.msra.mxu0 %v180_v6  ;;  %469 = vmatpush1.msra.mxu1 %v246_v10  ;;  %v175_v18 = vld [vmem:[%s1393_s2 + $0xa8] sm:$0xff]  ;;  %v241_v19 = vld [vmem:[%s1393_s2 + $0x2b8] sm:$0xff]  ;;  %v174_v20 = vld [vmem:[%s1393_s2 + $0xa0] sm:$0xff] }
   0x8   :  { %323 = vmatprep.subr.mxu0 %v179_v9  ;;  %470 = vmatprep.subr.mxu1 %v245_v12  ;;  %v240_v21 = vld [vmem:[%s1393_s2 + $0x2b0] sm:$0xff]  ;;  %v173_v22 = vld [vmem:[%s1393_s2 + $0x98] sm:$0xff]  ;;  %v239_v23 = vld [vmem:[%s1393_s2 + $0x2a8] sm:$0xff] }
   0x9   :  { %324 = vmatpush1.msra.mxu0 %v178_v11  ;;  %471 = vmatpush1.msra.mxu1 %v244_v13  ;;  %v172_v24 = vld [vmem:[%s1393_s2 + $0x90] sm:$0xff]  ;;  %v238_v25 = vld [vmem:[%s1393_s2 + $0x2a0] sm:$0xff]  ;;  %v171_v26 = vld [vmem:[%s1393_s2 + $0x88] sm:$0xff] }
   0xa   :  { %325 = vmatprep.subr.mxu0 %v177_v14  ;;  %472 = vmatprep.subr.mxu1 %v243_v15  ;;  %v237_v27 = vld [vmem:[%s1393_s2 + $0x298] sm:$0xff]  ;;  %v170_v28 = vld [vmem:[%s1393_s2 + $0x80] sm:$0xff]  ;;  %v236_v29 = vld [vmem:[%s1393_s2 + $0x290] sm:$0xff] }
   0xb   :  { %326 = vmatpush1.msra.mxu0 %v176_v16  ;;  %473 = vmatpush1.msra.mxu1 %v242_v17  ;;  %v169_v30 = vld [vmem:[%s1393_s2 + $0x78] sm:$0xff]  ;;  %v235_v31 = vld [vmem:[%s1393_s2 + $0x288] sm:$0xff]  ;;  %v168_v32 = vld [vmem:[%s1393_s2 + $0x70] sm:$0xff] }
   0xc   :  { %327 = vmatprep.subr.mxu0 %v175_v18  ;;  %474 = vmatprep.subr.mxu1 %v241_v19  ;;  %v234_v33 = vld [vmem:[%s1393_s2 + $0x280] sm:$0xff]  ;;  %v167_v34 = vld [vmem:[%s1393_s2 + $0x68] sm:$0xff]  ;;  %v233_v35 = vld [vmem:[%s1393_s2 + $0x278] sm:$0xff] }
   0xd   :  { %328 = vmatpush1.msra.mxu0 %v174_v20  ;;  %475 = vmatpush1.msra.mxu1 %v240_v21  ;;  %v166_v36 = vld [vmem:[%s1393_s2 + $0x60] sm:$0xff]  ;;  %v232_v37 = vld [vmem:[%s1393_s2 + $0x270] sm:$0xff]  ;;  %v165_v38 = vld [vmem:[%s1393_s2 + $0x58] sm:$0xff] }
   0xe   :  { %329 = vmatprep.subr.mxu0 %v173_v22  ;;  %476 = vmatprep.subr.mxu1 %v239_v23  ;;  %v231_v39 = vld [vmem:[%s1393_s2 + $0x268] sm:$0xff]  ;;  %v164_v40 = vld [vmem:[%s1393_s2 + $0x50] sm:$0xff]  ;;  %v230_v41 = vld [vmem:[%s1393_s2 + $0x260] sm:$0xff] }
   0xf   :  { %330 = vmatpush1.msra.mxu0 %v172_v24  ;;  %477 = vmatpush1.msra.mxu1 %v238_v25  ;;  %v163_v42 = vld [vmem:[%s1393_s2 + $0x48] sm:$0xff]  ;;  %v229_v43 = vld [vmem:[%s1393_s2 + $0x258] sm:$0xff]  ;;  %v162_v44 = vld [vmem:[%s1393_s2 + $0x40] sm:$0xff] }
  0x10   :  { %331 = vmatprep.subr.mxu0 %v171_v26  ;;  %478 = vmatprep.subr.mxu1 %v237_v27  ;;  %v228_v45 = vld [vmem:[%s1393_s2 + $0x250] sm:$0xff]  ;;  %v161_v46 = vld [vmem:[%s1393_s2 + $0x38] sm:$0xff]  ;;  %v227_v47 = vld [vmem:[%s1393_s2 + $0x248] sm:$0xff] }
  0x11   :  { %332 = vmatpush1.msra.mxu0 %v170_v28  ;;  %479 = vmatpush1.msra.mxu1 %v236_v29  ;;  %v160_v48 = vld [vmem:[%s1393_s2 + $0x30] sm:$0xff]  ;;  %v226_v49 = vld [vmem:[%s1393_s2 + $0x240] sm:$0xff]  ;;  %v159_v50 = vld [vmem:[%s1393_s2 + $0x28] sm:$0xff] }
  0x12   :  { %333 = vmatprep.subr.mxu0 %v169_v30  ;;  %480 = vmatprep.subr.mxu1 %v235_v31  ;;  %v225_v51 = vld [vmem:[%s1393_s2 + $0x238] sm:$0xff]  ;;  %v158_v52 = vld [vmem:[%s1393_s2 + $0x20] sm:$0xff]  ;;  %v224_v53 = vld [vmem:[%s1393_s2 + $0x230] sm:$0xff] }
  0x13   :  { %334 = vmatpush1.msra.mxu0 %v168_v32  ;;  %481 = vmatpush1.msra.mxu1 %v234_v33  ;;  %v157_v54 = vld [vmem:[%s1393_s2 + $0x18] sm:$0xff]  ;;  %v223_v55 = vld [vmem:[%s1393_s2 + $0x228] sm:$0xff]  ;;  %v156_v56 = vld [vmem:[%s1393_s2 + $0x10] sm:$0xff] }
  0x14   :  { %335 = vmatprep.subr.mxu0 %v167_v34  ;;  %482 = vmatprep.subr.mxu1 %v233_v35  ;;  %v222_v57 = vld [vmem:[%s1393_s2 + $0x220] sm:$0xff]  ;;  %v155_v58 = vld [vmem:[%s1393_s2 + $0x8] sm:$0xff]  ;;  %v221_v59 = vld [vmem:[%s1393_s2 + $0x218] sm:$0xff] }
  0x15   :  { %336 = vmatpush1.msra.mxu0 %v166_v36  ;;  %483 = vmatpush1.msra.mxu1 %v232_v37  ;;  %v154_v60 = vld [vmem:[%s1393_s2] sm:$0xff]  ;;  %v220_v61 = vld [vmem:[%s1393_s2 + $0x210] sm:$0xff]  ;;  %v217_v62 = vld [vmem:[%s1393_s2 + $0x1f8] sm:$0xff] }
  0x16   :  { %337 = vmatprep.subr.mxu0 %v165_v38  ;;  %484 = vmatprep.subr.mxu1 %v231_v39  ;;  %v219_v63 = vld [vmem:[%s1393_s2 + $0x208] sm:$0xff]  ;;  %v216_v0 = vld [vmem:[%s1393_s2 + $0x1f0] sm:$0xff]  ;;  %v218_v1 = vld [vmem:[%s1393_s2 + $0x200] sm:$0xff] }
  0x17   :  { %338 = vmatpush1.msra.mxu0 %v164_v40  ;;  %485 = vmatpush1.msra.mxu1 %v230_v41  ;;  %v215_v2 = vld [vmem:[%s1393_s2 + $0x1e8] sm:$0xff]  ;;  %v273_v3 = vld [vmem:[%s1393_s2 + $0x3b8] sm:$0xff]  ;;  %v214_v4 = vld [vmem:[%s1393_s2 + $0x1e0] sm:$0xff] }
  0x18   :  { %339 = vmatprep.subr.mxu0 %v163_v42  ;;  %486 = vmatprep.subr.mxu1 %v229_v43  ;;  %v272_v5 = vld [vmem:[%s1393_s2 + $0x3b0] sm:$0xff]  ;;  %v213_v6 = vld [vmem:[%s1393_s2 + $0x1d8] sm:$0xff]  ;;  %v271_v7 = vld [vmem:[%s1393_s2 + $0x3a8] sm:$0xff] }
  0x19   :  { %340 = vmatpush1.msra.mxu0 %v162_v44  ;;  %487 = vmatpush1.msra.mxu1 %v228_v45  ;;  %v212_v8 = vld [vmem:[%s1393_s2 + $0x1d0] sm:$0xff]  ;;  %v270_v9 = vld [vmem:[%s1393_s2 + $0x3a0] sm:$0xff]  ;;  %v211_v10 = vld [vmem:[%s1393_s2 + $0x1c8] sm:$0xff] }
  0x1a   :  { %341 = vmatprep.subr.mxu0 %v161_v46  ;;  %488 = vmatprep.subr.mxu1 %v227_v47  ;;  %v269_v11 = vld [vmem:[%s1393_s2 + $0x398] sm:$0xff]  ;;  %v210_v12 = vld [vmem:[%s1393_s2 + $0x1c0] sm:$0xff]  ;;  %v268_v13 = vld [vmem:[%s1393_s2 + $0x390] sm:$0xff] }
  0x1b   :  { %342 = vmatpush1.msra.mxu0 %v160_v48  ;;  %489 = vmatpush1.msra.mxu1 %v226_v49  ;;  %v209_v14 = vld [vmem:[%s1393_s2 + $0x1b8] sm:$0xff]  ;;  %v267_v15 = vld [vmem:[%s1393_s2 + $0x388] sm:$0xff]  ;;  %v208_v16 = vld [vmem:[%s1393_s2 + $0x1b0] sm:$0xff] }
  0x1c   :  { %343 = vmatprep.subr.mxu0 %v159_v50  ;;  %490 = vmatprep.subr.mxu1 %v225_v51  ;;  %v266_v17 = vld [vmem:[%s1393_s2 + $0x380] sm:$0xff]  ;;  %v207_v19 = vld [vmem:[%s1393_s2 + $0x1a8] sm:$0xff]  ;;  %v265_v20 = vld [vmem:[%s1393_s2 + $0x378] sm:$0xff] }
  0x1d   :  { %344 = vmatpush1.msra.mxu0 %v158_v52  ;;  %491 = vmatpush1.msra.mxu1 %v224_v53  ;;  %v14_v18 = vld [vmem:[%s1394_s0] sm:$0xf]  ;;  %v264_v23 = vld [vmem:[%s1393_s2 + $0x370] sm:$0xff]  ;;  %v205_v24 = vld [vmem:[%s1393_s2 + $0x198] sm:$0xff] }
  0x1e   :  { %345 = vmatprep.subr.mxu0 %v157_v54  ;;  %492 = vmatprep.subr.mxu1 %v223_v55  ;;  %v15_v21 = vsub.f32 0.0, %v14_v18  ;;  %v206_v22 = vld [vmem:[%s1393_s2 + $0x1a0] sm:$0xff]  ;;  %v263_v25 = vld [vmem:[%s1393_s2 + $0x368] sm:$0xff]  ;;  %v204_v27 = vld [vmem:[%s1393_s2 + $0x190] sm:$0xff] }
  0x1f   :  { %346 = vmatpush1.msra.mxu0 %v156_v56  ;;  %493 = vmatpush1.msra.mxu1 %v222_v57  ;;  %v262_v28 = vld [vmem:[%s1393_s2 + $0x360] sm:$0xff]  ;;  %v203_v29 = vld [vmem:[%s1393_s2 + $0x188] sm:$0xff]  ;;  %v261_v30 = vld [vmem:[%s1393_s2 + $0x358] sm:$0xff] }
  0x20   :  { %347 = vmatprep.subr.mxu0 %v155_v58  ;;  %494 = vmatprep.subr.mxu1 %v221_v59  ;;  %v16_v26 = vmul.f32 1.442695, %v15_v21  ;;  %v202_v31 = vld [vmem:[%s1393_s2 + $0x180] sm:$0xff]  ;;  %v260_v32 = vld [vmem:[%s1393_s2 + $0x350] sm:$0xff]  ;;  %v201_v33 = vld [vmem:[%s1393_s2 + $0x178] sm:$0xff] }
  0x21   :  { %348 = vmatpush1.msra.mxu0 %v154_v60  ;;  %495 = vmatpush1.msra.mxu1 %v220_v61  ;;  %v259_v34 = vld [vmem:[%s1393_s2 + $0x348] sm:$0xff]  ;;  %v200_v35 = vld [vmem:[%s1393_s2 + $0x170] sm:$0xff]  ;;  %v258_v36 = vld [vmem:[%s1393_s2 + $0x340] sm:$0xff]  ;;  %v78_v61 = vlaneseq }
  0x22   :  { %349 = vmatprep.subr.mxu0 %v217_v62  ;;  %496 = vmatprep.subr.mxu1 %v219_v63  ;;  %662 = vpow2.f32 %v16_v26  ;;  %v199_v37 = vld [vmem:[%s1393_s2 + $0x168] sm:$0xff]  ;;  %v257_v38 = vld [vmem:[%s1393_s2 + $0x338] sm:$0xff]  ;;  %v198_v39 = vld [vmem:[%s1393_s2 + $0x160] sm:$0xff] }
  0x23   :  { %350 = vmatpush2.msra.mxu0 %v216_v0  ;;  %497 = vmatpush1.msra.mxu1 %v218_v1  ;;  %v256_v40 = vld [vmem:[%s1393_s2 + $0x330] sm:$0xff]  ;;  %v197_v41 = vld [vmem:[%s1393_s2 + $0x158] sm:$0xff]  ;;  %v255_v42 = vld [vmem:[%s1393_s2 + $0x328] sm:$0xff]  ;;  %v79_v62 = vshrl.u32 %v78_v61, 7 }
  0x24   :  { %351 = vmatprep.subr.mxu0 %v215_v2  ;;  %506 = vmatprep.subr.mxu1 %v273_v3  ;;  %v196_v43 = vld [vmem:[%s1393_s2 + $0x150] sm:$0xff]  ;;  %v254_v44 = vld [vmem:[%s1393_s2 + $0x320] sm:$0xff]  ;;  %v195_v45 = vld [vmem:[%s1393_s2 + $0x148] sm:$0xff] }
  0x25   :  { %352 = vmatpush2.msra.mxu0 %v214_v4  ;;  %507 = vmatpush2.msra.mxu1 %v272_v5  ;;  %v253_v46 = vld [vmem:[%s1393_s2 + $0x318] sm:$0xff]  ;;  %v194_v47 = vld [vmem:[%s1393_s2 + $0x140] sm:$0xff]  ;;  %v252_v48 = vld [vmem:[%s1393_s2 + $0x310] sm:$0xff]  ;;  %v92_v63 = vsub.s32 3, %v79_v62  ;;  %v88_v0 = vsub.s32 2, %v79_v62  ;;  %v84_v1 = vsub.s32 1, %v79_v62 }
  0x26   :  { %353 = vmatprep.subr.mxu0 %v213_v6  ;;  %508 = vmatprep.subr.mxu1 %v271_v7  ;;  %v193_v49 = vld [vmem:[%s1393_s2 + $0x138] sm:$0xff]  ;;  %v251_v50 = vld [vmem:[%s1393_s2 + $0x308] sm:$0xff]  ;;  %v192_v51 = vld [vmem:[%s1393_s2 + $0x130] sm:$0xff]  ;;  %v80_v2 = vsub.s32 0, %v79_v62 }
  0x27   :  { %354 = vmatpush2.msra.mxu0 %v212_v8  ;;  %509 = vmatpush2.msra.mxu1 %v270_v9  ;;  %v250_v52 = vld [vmem:[%s1393_s2 + $0x300] sm:$0xff]  ;;  %v191_v53 = vld [vmem:[%s1393_s2 + $0x128] sm:$0xff]  ;;  %v189_v56 = vld [vmem:[%s1393_s2 + $0x118] sm:$0xff] }
  0x28   :  { %355 = vmatprep.subr.mxu0 %v211_v10  ;;  %510 = vmatprep.subr.mxu1 %v269_v11  ;;  %v190_v55 = vld [vmem:[%s1393_s2 + $0x120] sm:$0xff]  ;;  %v188_v58 = vld [vmem:[%s1393_s2 + $0x110] sm:$0xff]  ;;  %v187_v59 = vld [vmem:[%s1393_s2 + $0x108] sm:$0xff] }
  0x29   :  { %356 = vmatpush2.msra.mxu0 %v210_v12  ;;  %511 = vmatpush2.msra.mxu1 %v268_v13  ;;  %v186_v60 = vld [vmem:[%s1393_s2 + $0x100] sm:$0xff]  ;;  %v24_v3 = vld [vmem:[%s1395_s1 + $0x18] sm:$0xff]  ;;  %v23_v5 = vld [vmem:[%s1395_s1 + $0x10] sm:$0xff] }
  0x2a   :  { %357 = vmatprep.subr.mxu0 %v209_v14  ;;  %512 = vmatprep.subr.mxu1 %v267_v15  ;;  %v22_v6 = vld [vmem:[%s1395_s1 + $0x8] sm:$0xff]  ;;  %v21_v7 = vld [vmem:[%s1395_s1] sm:$0xff]  ;;  %v28_v12 = vld [vmem:[%s1395_s1 + $0x38] sm:$0xff] }
  0x2b   :  { %358 = vmatpush2.msra.mxu0 %v208_v16  ;;  %513 = vmatpush2.msra.mxu1 %v266_v17  ;;  %v26_v13 = vld [vmem:[%s1395_s1 + $0x28] sm:$0xff]  ;;  %v27_v18 = vld [vmem:[%s1395_s1 + $0x30] sm:$0xff]  ;;  %v45_v61 = vld [vmem:[%s1395_s1 + $0xc0] sm:$0xff] }
  0x2c   :  { %359 = vmatprep.subr.mxu0 %v207_v19  ;;  %514 = vmatprep.subr.mxu1 %v265_v20  ;;  %v25_v19 = vld [vmem:[%s1395_s1 + $0x20] sm:$0xff]  ;;  %v52_v62 = vld [vmem:[%s1395_s1 + $0xf8] sm:$0xff] }
  0x2d   :  { %360 = vmatpush2.msra.mxu0 %v206_v22  ;;  %515 = vmatpush2.msra.mxu1 %v264_v23  ;;  %v32_v22 = vld [vmem:[%s1395_s1 + $0x58] sm:$0xff]  ;;  %v30_v23 = vld [vmem:[%s1395_s1 + $0x48] sm:$0xff] }
  0x2e   :  { %361 = vmatprep.subr.mxu0 %v205_v24  ;;  %516 = vmatprep.subr.mxu1 %v263_v25 }
  0x2f   :  { %362 = vmatpush2.msra.mxu0 %v204_v27  ;;  %517 = vmatpush2.msra.mxu1 %v262_v28  ;;  %v663_v54 = vpop.eup %662  ;;  %v31_v27 = vld [vmem:[%s1395_s1 + $0x50] sm:$0xff] }
  0x30   :  { %363 = vmatprep.subr.mxu0 %v203_v29  ;;  %518 = vmatprep.subr.mxu1 %v261_v30  ;;  %v18_v57 = vadd.f32 1.0, %v663_v54  ;;  %v29_v29 = vld [vmem:[%s1395_s1 + $0x40] sm:$0xff]  ;;  %v36_v30 = vld [vmem:[%s1395_s1 + $0x78] sm:$0xff] }
  0x31   :  { %364 = vmatpush2.msra.mxu0 %v202_v31  ;;  %519 = vmatpush2.msra.mxu1 %v260_v32  ;;  %v34_v31 = vld [vmem:[%s1395_s1 + $0x68] sm:$0xff]  ;;  %v48_v54 = vld [vmem:[%s1395_s1 + $0xd8] sm:$0xff] }
  0x32   :  { %365 = vmatprep.subr.mxu0 %v201_v33  ;;  %520 = vmatprep.subr.mxu1 %v259_v34  ;;  %664 = vrcp.f32 %v18_v57 }
  0x33   :  { %366 = vmatpush2.msra.mxu0 %v200_v35  ;;  %521 = vmatpush2.msra.mxu1 %v258_v36  ;;  %v35_v35 = vld [vmem:[%s1395_s1 + $0x70] sm:$0xff] }
  0x34   :  { %367 = vmatprep.subr.mxu0 %v199_v37  ;;  %522 = vmatprep.subr.mxu1 %v257_v38  ;;  %v33_v37 = vld [vmem:[%s1395_s1 + $0x60] sm:$0xff]  ;;  %v40_v38 = vld [vmem:[%s1395_s1 + $0x98] sm:$0xff] }
  0x35   :  { %368 = vmatpush2.msra.mxu0 %v198_v39  ;;  %523 = vmatpush2.msra.mxu1 %v256_v40  ;;  %v38_v39 = vld [vmem:[%s1395_s1 + $0x88] sm:$0xff] }
  0x36   :  { %369 = vmatprep.subr.mxu0 %v197_v41  ;;  %524 = vmatprep.subr.mxu1 %v255_v42 }
  0x37   :  { %370 = vmatpush2.msra.mxu0 %v196_v43  ;;  %525 = vmatpush2.msra.mxu1 %v254_v44  ;;  %v39_v43 = vld [vmem:[%s1395_s1 + $0x90] sm:$0xff] }
  0x38   :  { %371 = vmatprep.subr.mxu0 %v195_v45  ;;  %526 = vmatprep.subr.mxu1 %v253_v46  ;;  %v37_v45 = vld [vmem:[%s1395_s1 + $0x80] sm:$0xff]  ;;  %v44_v46 = vld [vmem:[%s1395_s1 + $0xb8] sm:$0xff] }
  0x39   :  { %372 = vmatpush2.msra.mxu0 %v194_v47  ;;  %527 = vmatpush2.msra.mxu1 %v252_v48  ;;  %v42_v47 = vld [vmem:[%s1395_s1 + $0xa8] sm:$0xff] }
  0x3a   :  { %373 = vmatprep.subr.mxu0 %v193_v49  ;;  %528 = vmatprep.subr.mxu1 %v251_v50 }
  0x3b   :  { %374 = vmatpush2.msra.mxu0 %v192_v51  ;;  %529 = vmatpush2.msra.mxu1 %v250_v52  ;;  %v43_v51 = vld [vmem:[%s1395_s1 + $0xb0] sm:$0xff] }
  0x3c   :  { %375 = vmatprep.subr.mxu0 %v191_v53  ;;  %v41_v53 = vld [vmem:[%s1395_s1 + $0xa0] sm:$0xff] }
  0x3d   :  { %376 = vmatpush2.msra.mxu0 %v190_v55  ;;  %v46_v55 = vld [vmem:[%s1395_s1 + $0xc8] sm:$0xff] }
  0x3e   :  { %377 = vmatprep.subr.mxu0 %v189_v56 }
  0x3f   :  { %378 = vmatpush2.msra.mxu0 %v188_v58  ;;  %v665_v4 = vpop.eup %664 }
  0x40   :  { %379 = vmatprep.subr.mxu0 %v187_v59  ;;  %v1061_v8 = vrot.slane %v665_v4, %v92_v63  ;;  %v1063_v9 = vrot.slane %v665_v4, %v88_v0  ;;  %v1065_v10 = vrot.slane %v665_v4, %v84_v1  ;;  %v1067_v11 = vrot.slane %v665_v4, %v80_v2  ;;  %v47_v59 = vld [vmem:[%s1395_s1 + $0xd0] sm:$0xff]  ;;  %v50_v63 = vld [vmem:[%s1395_s1 + $0xe8] sm:$0xff] }
  0x41   :  { %380 = vmatpush2.msra.mxu0 %v186_v60 }
  0x42   :  { %v101_v14 = vmul.f32 %v1061_v8, %v24_v3  ;;  %v100_v15 = vmul.f32 %v1063_v9, %v23_v5  ;;  %v99_v16 = vmul.f32 %v1065_v10, %v22_v6  ;;  %v98_v17 = vmul.f32 %v1067_v11, %v21_v7  ;;  %v51_v3 = vld [vmem:[%s1395_s1 + $0xf0] sm:$0xff]  ;;  %v49_v5 = vld [vmem:[%s1395_s1 + $0xe0] sm:$0xff]  ;;  %v56_v6 = vld [vmem:[%s1395_s1 + $0x118] sm:$0xff] }
  0x43   :  { %v105_v20 = vmul.f32 %v1061_v8, %v28_v12  ;;  %v103_v21 = vmul.f32 %v1065_v10, %v26_v13  ;;  %v104_v24 = vmul.f32 %v1063_v9, %v27_v18  ;;  %v102_v25 = vmul.f32 %v1067_v11, %v25_v19  ;;  %v54_v7 = vld [vmem:[%s1395_s1 + $0x108] sm:$0xff]  ;;  %v60_v18 = vld [vmem:[%s1395_s1 + $0x138] sm:$0xff] }
  0x44   :  { %648 = vmatprep.mubr.msk.f32.mxu1 %vm274_vm0, %v101_v14  ;;  %381 = vmatprep.mubr.f32.mxu0 %v99_v16  ;;  %v109_v26 = vmul.f32 %v1061_v8, %v32_v22  ;;  %v107_v28 = vmul.f32 %v1065_v10, %v30_v23  ;;  %v108_v32 = vmul.f32 %v1063_v9, %v31_v27  ;;  %v58_v19 = vld [vmem:[%s1395_s1 + $0x128] sm:$0xff]  ;;  %v59_v23 = vld [vmem:[%s1395_s1 + $0x130] sm:$0xff] }
  0x45   :  { %531 = vmatmul.mubr.f32.vlgmr.msra.gmra.mxu1 %v100_v15  ;;  %382 = vmatmul.mubr.f32.vlgmr.msra.gmra.mxu0 %v98_v17  ;;  %v106_v33 = vmul.f32 %v1067_v11, %v29_v29  ;;  %v113_v34 = vmul.f32 %v1061_v8, %v36_v30  ;;  %v111_v36 = vmul.f32 %v1065_v10, %v34_v31  ;;  %v55_v15 = vld [vmem:[%s1395_s1 + $0x110] sm:$0xff]  ;;  %v53_v17 = vld [vmem:[%s1395_s1 + $0x100] sm:$0xff]  ;;  %v62_v27 = vld [vmem:[%s1395_s1 + $0x148] sm:$0xff] }
  0x46   :  { %649 = vmatprep.mubr.msk.f32.mxu1 %vm274_vm0, %v105_v20  ;;  %387 = vmatprep.mubr.f32.mxu0 %v103_v21  ;;  %v112_v40 = vmul.f32 %v1063_v9, %v35_v35  ;;  %v110_v41 = vmul.f32 %v1067_v11, %v33_v37  ;;  %v117_v42 = vmul.f32 %v1061_v8, %v40_v38  ;;  %v63_v31 = vld [vmem:[%s1395_s1 + $0x150] sm:$0xff]  ;;  %v66_v35 = vld [vmem:[%s1395_s1 + $0x168] sm:$0xff] }
  0x47   :  { %v115_v44 = vmul.f32 %v1065_v10, %v38_v39  ;;  %v116_v48 = vmul.f32 %v1063_v9, %v39_v43  ;;  %v114_v49 = vmul.f32 %v1067_v11, %v37_v45  ;;  %v121_v50 = vmul.f32 %v1061_v8, %v44_v46  ;;  %v67_v39 = vld [vmem:[%s1395_s1 + $0x170] sm:$0xff]  ;;  %v70_v43 = vld [vmem:[%s1395_s1 + $0x188] sm:$0xff] }
  0x48   :  { %v119_v52 = vmul.f32 %v1065_v10, %v42_v47  ;;  %v120_v56 = vmul.f32 %v1063_v9, %v43_v51  ;;  %v118_v57 = vmul.f32 %v1067_v11, %v41_v53  ;;  %v125_v58 = vmul.f32 %v1061_v8, %v48_v54  ;;  %v71_v47 = vld [vmem:[%s1395_s1 + $0x190] sm:$0xff]  ;;  %v74_v51 = vld [vmem:[%s1395_s1 + $0x1a8] sm:$0xff] }
  0x49   :  { %537 = vmatmul.mubr.f32.gmra.mxu1 %v104_v24  ;;  %388 = vmatmul.mubr.f32.gmra.mxu0 %v102_v25  ;;  %v123_v60 = vmul.f32 %v1065_v10, %v46_v55  ;;  %v124_v0 = vmul.f32 %v1063_v9, %v47_v59  ;;  %v122_v1 = vmul.f32 %v1067_v11, %v45_v61  ;;  %v57_v25 = vld [vmem:[%s1395_s1 + $0x120] sm:$0xff]  ;;  %v75_v55 = vld [vmem:[%s1395_s1 + $0x1b0] sm:$0xff] }
  0x4a   :  { %650 = vmatprep.mubr.msk.f32.mxu1 %vm274_vm0, %v109_v26  ;;  %393 = vmatprep.mubr.f32.mxu0 %v107_v28  ;;  %v129_v2 = vmul.f32 %v1061_v8, %v52_v62  ;;  %v127_v4 = vmul.f32 %v1065_v10, %v50_v63  ;;  %v128_v12 = vmul.f32 %v1063_v9, %v51_v3  ;;  %v64_v26 = vld [vmem:[%s1395_s1 + $0x158] sm:$0xff] }
  0x4b   :  { %v126_v13 = vmul.f32 %v1067_v11, %v49_v5  ;;  %v133_v14 = vmul.f32 %v1061_v8, %v56_v6  ;;  %v131_v16 = vmul.f32 %v1065_v10, %v54_v7  ;;  %v132_v20 = vmul.f32 %v1063_v9, %v55_v15 }
  0x4c   :  { %v130_v21 = vmul.f32 %v1067_v11, %v53_v17  ;;  %v137_v22 = vmul.f32 %v1061_v8, %v60_v18  ;;  %v135_v24 = vmul.f32 %v1065_v10, %v58_v19  ;;  %v136_v28 = vmul.f32 %v1063_v9, %v59_v23 }
  0x4d   :  { %543 = vmatmul.mubr.f32.gmra.mxu1 %v108_v32  ;;  %394 = vmatmul.mubr.f32.gmra.mxu0 %v106_v33  ;;  %v134_v29 = vmul.f32 %v1067_v11, %v57_v25  ;;  %v141_v30 = vmul.f32 %v1061_v8, %v64_v26  ;;  %v139_v32 = vmul.f32 %v1065_v10, %v62_v27  ;;  %v61_v33 = vld [vmem:[%s1395_s1 + $0x140] sm:$0xff] }
  0x4e   :  { %651 = vmatprep.mubr.msk.f32.mxu1 %vm274_vm0, %v113_v34  ;;  %399 = vmatprep.mubr.f32.mxu0 %v111_v36  ;;  %v68_v34 = vld [vmem:[%s1395_s1 + $0x178] sm:$0xff]  ;;  %v140_v36 = vmul.f32 %v1063_v9, %v63_v31  ;;  %v138_v37 = vmul.f32 %v1067_v11, %v61_v33 }
  0x4f   :  { %v145_v38 = vmul.f32 %v1061_v8, %v68_v34 }
  0x51   :  { %549 = vmatmul.mubr.f32.gmra.mxu1 %v112_v40  ;;  %400 = vmatmul.mubr.f32.gmra.mxu0 %v110_v41  ;;  %v143_v40 = vmul.f32 %v1065_v10, %v66_v35  ;;  %v65_v41 = vld [vmem:[%s1395_s1 + $0x160] sm:$0xff] }
  0x52   :  { %652 = vmatprep.mubr.msk.f32.mxu1 %vm274_vm0, %v117_v42  ;;  %405 = vmatprep.mubr.f32.mxu0 %v115_v44  ;;  %v72_v42 = vld [vmem:[%s1395_s1 + $0x198] sm:$0xff]  ;;  %v144_v44 = vmul.f32 %v1063_v9, %v67_v39  ;;  %v142_v45 = vmul.f32 %v1067_v11, %v65_v41 }
  0x53   :  { %v149_v46 = vmul.f32 %v1061_v8, %v72_v42 }
  0x55   :  { %555 = vmatmul.mubr.f32.gmra.mxu1 %v116_v48  ;;  %406 = vmatmul.mubr.f32.gmra.mxu0 %v114_v49  ;;  %v147_v48 = vmul.f32 %v1065_v10, %v70_v43  ;;  %v69_v49 = vld [vmem:[%s1395_s1 + $0x180] sm:$0xff] }
  0x56   :  { %653 = vmatprep.mubr.msk.f32.mxu1 %vm274_vm0, %v121_v50  ;;  %411 = vmatprep.mubr.f32.mxu0 %v119_v52  ;;  %v76_v50 = vld [vmem:[%s1395_s1 + $0x1b8] sm:$0xff]  ;;  %v148_v52 = vmul.f32 %v1063_v9, %v71_v47  ;;  %v146_v53 = vmul.f32 %v1067_v11, %v69_v49 }
  0x57   :  { %v153_v54 = vmul.f32 %v1061_v8, %v76_v50 }
  0x59   :  { %561 = vmatmul.mubr.f32.gmra.mxu1 %v120_v56  ;;  %412 = vmatmul.mubr.f32.gmra.mxu0 %v118_v57  ;;  %v151_v56 = vmul.f32 %v1065_v10, %v74_v51  ;;  %v73_v57 = vld [vmem:[%s1395_s1 + $0x1a0] sm:$0xff] }
  0x5a   :  { %654 = vmatprep.mubr.msk.f32.mxu1 %vm274_vm0, %v125_v58  ;;  %417 = vmatprep.mubr.f32.mxu0 %v123_v60  ;;  %v152_v58 = vmul.f32 %v1063_v9, %v75_v55  ;;  %v150_v59 = vmul.f32 %v1067_v11, %v73_v57 }
  0x5d   :  { %567 = vmatmul.mubr.f32.gmra.mxu1 %v124_v0  ;;  %418 = vmatmul.mubr.f32.gmra.mxu0 %v122_v1 }
  0x5e   :  { %655 = vmatprep.mubr.msk.f32.mxu1 %vm274_vm0, %v129_v2  ;;  %423 = vmatprep.mubr.f32.mxu0 %v127_v4 }
  0x61   :  { %573 = vmatmul.mubr.f32.gmra.mxu1 %v128_v12  ;;  %424 = vmatmul.mubr.f32.gmra.mxu0 %v126_v13 }
  0x62   :  { %656 = vmatprep.mubr.msk.f32.mxu1 %vm274_vm0, %v133_v14  ;;  %429 = vmatprep.mubr.f32.mxu0 %v131_v16 }
  0x65   :  { %579 = vmatmul.mubr.f32.gmra.mxu1 %v132_v20  ;;  %430 = vmatmul.mubr.f32.gmra.mxu0 %v130_v21 }
  0x66   :  { %657 = vmatprep.mubr.msk.f32.mxu1 %vm274_vm0, %v137_v22  ;;  %435 = vmatprep.mubr.f32.mxu0 %v135_v24 }
  0x69   :  { %585 = vmatmul.mubr.f32.gmra.mxu1 %v136_v28  ;;  %436 = vmatmul.mubr.f32.gmra.mxu0 %v134_v29 }
  0x6a   :  { %658 = vmatprep.mubr.msk.f32.mxu1 %vm274_vm0, %v141_v30  ;;  %441 = vmatprep.mubr.f32.mxu0 %v139_v32 }
  0x6d   :  { %591 = vmatmul.mubr.f32.gmra.mxu1 %v140_v36  ;;  %442 = vmatmul.mubr.f32.gmra.mxu0 %v138_v37 }
  0x6e   :  { %659 = vmatprep.mubr.msk.f32.mxu1 %vm274_vm0, %v145_v38  ;;  %447 = vmatprep.mubr.f32.mxu0 %v143_v40 }
  0x71   :  { %597 = vmatmul.mubr.f32.gmra.mxu1 %v144_v44  ;;  %448 = vmatmul.mubr.f32.gmra.mxu0 %v142_v45 }
  0x72   :  { %660 = vmatprep.mubr.msk.f32.mxu1 %vm274_vm0, %v149_v46  ;;  %453 = vmatprep.mubr.f32.mxu0 %v147_v48 }
  0x75   :  { %603 = vmatmul.mubr.f32.gmra.mxu1 %v148_v52  ;;  %454 = vmatmul.mubr.f32.gmra.mxu0 %v146_v53 }
  0x76   :  { %661 = vmatprep.mubr.msk.f32.mxu1 %vm274_vm0, %v153_v54  ;;  %459 = vmatprep.mubr.f32.mxu0 %v151_v56 }
  0x79   :  { %609 = vmatmul.mubr.f32.gmra.mxu1 %v152_v58  ;;  %460 = vmatmul.mubr.f32.gmra.mxu0 %v150_v59 }
 0x105   :  { %v532_v8 = vpop.f32.mrf.mxu1  ;;  %v383_v60 = vpop.f32.mrf.mxu0 }
 0x106   :  { %v533_v61 = vadd.f32 %v532_v8, %v383_v60 }
 0x107   :  { %v534_v62 = vpop.f32.mrf.mxu1  ;;  %v385_v10 = vpop.f32.mrf.mxu0 }
 0x108   :  { %615 = vst [vmem:[%s1396_s3] sm:$0xff] %v533_v61  ;;  %v535_v63 = vadd.f32 %v534_v62, %v385_v10 }
 0x109   :  { %v538_v0 = vpop.f32.mrf.mxu1  ;;  %v389_v9 = vpop.f32.mrf.mxu0 }
 0x10a   :  { %617 = vst.msk [vmem:[%s1396_s3 + $0x8] sm:$0xff] %vm616_vm1, %v535_v63  ;;  %v539_v11 = vadd.f32 %v538_v0, %v389_v9 }
 0x10b   :  { %v540_v1 = vpop.f32.mrf.mxu1  ;;  %v391_v2 = vpop.f32.mrf.mxu0 }
 0x10c   :  { %618 = vst [vmem:[%s1396_s3 + $0x10] sm:$0xff] %v539_v11  ;;  %v541_v3 = vadd.f32 %v540_v1, %v391_v2 }
 0x10d   :  { %v544_v4 = vpop.f32.mrf.mxu1  ;;  %v395_v5 = vpop.f32.mrf.mxu0 }
 0x10e   :  { %619 = vst.msk [vmem:[%s1396_s3 + $0x18] sm:$0xff] %vm616_vm1, %v541_v3  ;;  %v545_v6 = vadd.f32 %v544_v4, %v395_v5 }
 0x10f   :  { %v546_v7 = vpop.f32.mrf.mxu1  ;;  %v397_v12 = vpop.f32.mrf.mxu0 }
 0x110   :  { %620 = vst [vmem:[%s1396_s3 + $0x20] sm:$0xff] %v545_v6  ;;  %v547_v13 = vadd.f32 %v546_v7, %v397_v12 }
 0x111   :  { %v550_v14 = vpop.f32.mrf.mxu1  ;;  %v401_v15 = vpop.f32.mrf.mxu0 }
 0x112   :  { %621 = vst.msk [vmem:[%s1396_s3 + $0x28] sm:$0xff] %vm616_vm1, %v547_v13  ;;  %v551_v16 = vadd.f32 %v550_v14, %v401_v15 }
 0x113   :  { %v552_v17 = vpop.f32.mrf.mxu1  ;;  %v403_v18 = vpop.f32.mrf.mxu0 }
 0x114   :  { %622 = vst [vmem:[%s1396_s3 + $0x30] sm:$0xff] %v551_v16  ;;  %v553_v19 = vadd.f32 %v552_v17, %v403_v18 }
 0x115   :  { %v556_v20 = vpop.f32.mrf.mxu1  ;;  %v407_v21 = vpop.f32.mrf.mxu0 }
 0x116   :  { %623 = vst.msk [vmem:[%s1396_s3 + $0x38] sm:$0xff] %vm616_vm1, %v553_v19  ;;  %v557_v22 = vadd.f32 %v556_v20, %v407_v21 }
 0x117   :  { %v558_v23 = vpop.f32.mrf.mxu1  ;;  %v409_v24 = vpop.f32.mrf.mxu0 }
 0x118   :  { %624 = vst [vmem:[%s1396_s3 + $0x40] sm:$0xff] %v557_v22  ;;  %v559_v25 = vadd.f32 %v558_v23, %v409_v24 }
 0x119   :  { %v562_v26 = vpop.f32.mrf.mxu1  ;;  %v413_v27 = vpop.f32.mrf.mxu0 }
 0x11a   :  { %625 = vst.msk [vmem:[%s1396_s3 + $0x48] sm:$0xff] %vm616_vm1, %v559_v25  ;;  %v563_v28 = vadd.f32 %v562_v26, %v413_v27 }
 0x11b   :  { %v564_v29 = vpop.f32.mrf.mxu1  ;;  %v415_v30 = vpop.f32.mrf.mxu0 }
 0x11c   :  { %626 = vst [vmem:[%s1396_s3 + $0x50] sm:$0xff] %v563_v28  ;;  %v565_v31 = vadd.f32 %v564_v29, %v415_v30 }
 0x11d   :  { %v568_v32 = vpop.f32.mrf.mxu1  ;;  %v419_v33 = vpop.f32.mrf.mxu0 }
 0x11e   :  { %627 = vst.msk [vmem:[%s1396_s3 + $0x58] sm:$0xff] %vm616_vm1, %v565_v31  ;;  %v569_v34 = vadd.f32 %v568_v32, %v419_v33 }
 0x11f   :  { %v570_v35 = vpop.f32.mrf.mxu1  ;;  %v421_v36 = vpop.f32.mrf.mxu0 }
 0x120   :  { %628 = vst [vmem:[%s1396_s3 + $0x60] sm:$0xff] %v569_v34  ;;  %v571_v37 = vadd.f32 %v570_v35, %v421_v36 }
 0x121   :  { %v574_v38 = vpop.f32.mrf.mxu1  ;;  %v425_v39 = vpop.f32.mrf.mxu0 }
 0x122   :  { %629 = vst.msk [vmem:[%s1396_s3 + $0x68] sm:$0xff] %vm616_vm1, %v571_v37  ;;  %v575_v40 = vadd.f32 %v574_v38, %v425_v39 }
 0x123   :  { %v576_v41 = vpop.f32.mrf.mxu1  ;;  %v427_v42 = vpop.f32.mrf.mxu0 }
 0x124   :  { %630 = vst [vmem:[%s1396_s3 + $0x70] sm:$0xff] %v575_v40  ;;  %v577_v43 = vadd.f32 %v576_v41, %v427_v42 }
 0x125   :  { %v580_v44 = vpop.f32.mrf.mxu1  ;;  %v431_v45 = vpop.f32.mrf.mxu0 }
 0x126   :  { %631 = vst.msk [vmem:[%s1396_s3 + $0x78] sm:$0xff] %vm616_vm1, %v577_v43  ;;  %v581_v46 = vadd.f32 %v580_v44, %v431_v45 }
 0x127   :  { %v582_v47 = vpop.f32.mrf.mxu1  ;;  %v433_v48 = vpop.f32.mrf.mxu0 }
 0x128   :  { %632 = vst [vmem:[%s1396_s3 + $0x80] sm:$0xff] %v581_v46  ;;  %v583_v49 = vadd.f32 %v582_v47, %v433_v48 }
 0x129   :  { %v586_v50 = vpop.f32.mrf.mxu1  ;;  %v437_v51 = vpop.f32.mrf.mxu0 }
 0x12a   :  { %633 = vst.msk [vmem:[%s1396_s3 + $0x88] sm:$0xff] %vm616_vm1, %v583_v49  ;;  %v587_v52 = vadd.f32 %v586_v50, %v437_v51 }
 0x12b   :  { %v588_v53 = vpop.f32.mrf.mxu1  ;;  %v439_v54 = vpop.f32.mrf.mxu0 }
 0x12c   :  { %634 = vst [vmem:[%s1396_s3 + $0x90] sm:$0xff] %v587_v52  ;;  %v589_v55 = vadd.f32 %v588_v53, %v439_v54 }
 0x12d   :  { %v592_v56 = vpop.f32.mrf.mxu1  ;;  %v443_v57 = vpop.f32.mrf.mxu0 }
 0x12e   :  { %635 = vst.msk [vmem:[%s1396_s3 + $0x98] sm:$0xff] %vm616_vm1, %v589_v55  ;;  %v593_v58 = vadd.f32 %v592_v56, %v443_v57 }
 0x12f   :  { %v594_v59 = vpop.f32.mrf.mxu1  ;;  %v445_v8 = vpop.f32.mrf.mxu0 }
 0x130   :  { %636 = vst [vmem:[%s1396_s3 + $0xa0] sm:$0xff] %v593_v58  ;;  %v595_v60 = vadd.f32 %v594_v59, %v445_v8 }
 0x131   :  { %v598_v61 = vpop.f32.mrf.mxu1  ;;  %v449_v62 = vpop.f32.mrf.mxu0 }
 0x132   :  { %637 = vst.msk [vmem:[%s1396_s3 + $0xa8] sm:$0xff] %vm616_vm1, %v595_v60  ;;  %v599_v10 = vadd.f32 %v598_v61, %v449_v62 }
 0x133   :  { %v600_v63 = vpop.f32.mrf.mxu1  ;;  %v451_v0 = vpop.f32.mrf.mxu0 }
 0x134   :  { %638 = vst [vmem:[%s1396_s3 + $0xb0] sm:$0xff] %v599_v10  ;;  %v601_v9 = vadd.f32 %v600_v63, %v451_v0 }
 0x135   :  { %v604_v11 = vpop.f32.mrf.mxu1  ;;  %v455_v1 = vpop.f32.mrf.mxu0 }
 0x136   :  { %639 = vst.msk [vmem:[%s1396_s3 + $0xb8] sm:$0xff] %vm616_vm1, %v601_v9  ;;  %v605_v2 = vadd.f32 %v604_v11, %v455_v1 }
 0x137   :  { %v606_v3 = vpop.f32.mrf.mxu1  ;;  %v457_v4 = vpop.f32.mrf.mxu0 }
 0x138   :  { %640 = vst [vmem:[%s1396_s3 + $0xc0] sm:$0xff] %v605_v2  ;;  %v607_v5 = vadd.f32 %v606_v3, %v457_v4 }
 0x139   :  { %v610_v6 = vpop.f32.mrf.mxu1  ;;  %v461_v7 = vpop.f32.mrf.mxu0 }
 0x13a   :  { %641 = vst.msk [vmem:[%s1396_s3 + $0xc8] sm:$0xff] %vm616_vm1, %v607_v5  ;;  %v611_v12 = vadd.f32 %v610_v6, %v461_v7 }
 0x13b   :  { %v612_v13 = vpop.f32.mrf.mxu1  ;;  %v463_v14 = vpop.f32.mrf.mxu0 }
 0x13c   :  { %642 = vst [vmem:[%s1396_s3 + $0xd0] sm:$0xff] %v611_v12  ;;  %v613_v15 = vadd.f32 %v612_v13, %v463_v14 }
 0x13e   :  { %643 = vst.msk [vmem:[%s1396_s3 + $0xd8] sm:$0xff] %vm616_vm1, %v613_v15 }

</bundles_post_ra>
